<compile_context>
chip_gen: v5e
topology: v5e:2x2
jax: 0.10.0
libtpu: 0.0.40
codegen_flags: <defaults>
</compile_context>

<pallas_src>
import functools

import jax
import jax.numpy as jnp
import numpy as np
from jax import lax
from jax.experimental import pallas as pl
from jax.experimental.pallas import tpu as pltpu

# open_clip ViT-B-16 BPE vocabulary special tokens.
SOT_TOKEN = 49406   # get_sot_token()
EOT_TOKEN = 49407   # get_eot_token()
VOCAB_SIZE = 49408  # get_vocab_size()

_LANE = 128
_SUBLANE = 8


def _round_up(x, m):
    return (x + m - 1) // m * m


def _pack_kernel(lens_ref, raw_ref, out_ref, *, sot, eot, ctx_real):
    """Pack left-aligned BPE ids into CLIP's [SOT] ... [EOT] 0... format.

    lens_ref: (TB, 1) int32      number of valid BPE ids per row
    raw_ref:  (TB, ctx_pad) int32 BPE ids left-aligned at lane 0
    out_ref:  (TB, ctx_pad) int32
    """
    blk_b, ctx_pad = out_ref.shape
    raw = raw_ref[...]
    # Clamp lengths: guards negative lengths and folds the overflow/truncation
    # case (len > ctx-2 -> EOT forced into slot ctx-1), so eot_pos = len + 1.
    lens = jnp.clip(lens_ref[...], 0, ctx_real - 2)          # (TB, 1)
    eot_pos = lens + jnp.int32(1)                             # (TB, 1)

    # Shift tokens one lane right so output position p holds raw[p-1].
    # (Lane-0 wraparound value is always overwritten by SOT below.)
    shifted = pltpu.roll(raw, shift=1, axis=1)

    pos = lax.broadcasted_iota(jnp.int32, (blk_b, ctx_pad), 1)
    out = jnp.where(
        pos == 0, jnp.int32(sot),
        jnp.where(pos == eot_pos, jnp.int32(eot),
                  jnp.where(pos < eot_pos, shifted, jnp.int32(0))))
    out_ref[...] = out


def clip_tokenize_pack(raw_tokens, lengths, context_length, *, block_rows=512):
    """Pallas path (batch-tiled, lane-dense).

    raw_tokens: (B, context_length) int — BPE ids, left-aligned; entries past
                `lengths[i]` are ignored.
    lengths:    (B,) int — number of valid BPE ids per row.
    Returns:    (B, context_length) int32 tokenized tensor.
    """
    B, ctx = raw_tokens.shape
    assert ctx == context_length
    assert context_length >= 2

    # Only convert if needed — keep the hot path free of an extra HBM pass.
    if raw_tokens.dtype != jnp.int32:
        raw_tokens = raw_tokens.astype(jnp.int32)
    if lengths.dtype != jnp.int32:
        lengths = lengths.astype(jnp.int32)
    lens2d = lengths.reshape(B, 1)

    # Lane-dense internal width (e.g. 77 -> 128) and 8-aligned batch tile.
    ctx_pad = _round_up(ctx, _LANE)
    tb = max(_SUBLANE, _round_up(min(block_rows, B), _SUBLANE))
    b_pad = _round_up(B, tb)

    if ctx_pad != ctx:
        raw_tokens = jnp.pad(raw_tokens, ((0, 0), (0, ctx_pad - ctx)))
    if b_pad != B:
        raw_tokens = jnp.pad(raw_tokens, ((0, b_pad - B), (0, 0)))
        lens2d = jnp.pad(lens2d, ((0, b_pad - B), (0, 0)))

    kernel = functools.partial(
        _pack_kernel, sot=SOT_TOKEN, eot=EOT_TOKEN, ctx_real=ctx)

    out = pl.pallas_call(
        kernel,
        out_shape=jax.ShapeDtypeStruct((b_pad, ctx_pad), jnp.int32),
        grid=(b_pad // tb,),
        in_specs=[
            pl.BlockSpec((tb, 1), lambda i: (i, 0)),
            pl.BlockSpec((tb, ctx_pad), lambda i: (i, 0)),
        ],
        out_specs=pl.BlockSpec((tb, ctx_pad), lambda i: (i, 0)),
        compiler_params=pltpu.CompilerParams(
            dimension_semantics=("parallel",)),
    )(lens2d, raw_tokens)

    if b_pad != B or ctx_pad != ctx:
        out = out[:B, :ctx]
    return out


def clip_tokenize_pack_jnp(raw_tokens, lengths, context_length):
    """Plain-XLA fallback for tiny batches (no Pallas launch overhead)."""
    B, ctx = raw_tokens.shape
    assert ctx == context_length
    raw = raw_tokens.astype(jnp.int32)
    lens = jnp.clip(lengths.astype(jnp.int32), 0, ctx - 2).reshape(B, 1)
    eot_pos = lens + 1
    pos = jnp.arange(ctx, dtype=jnp.int32)[None, :]
    shifted = jnp.roll(raw, 1, axis=1)
    return jnp.where(
        pos == 0, jnp.int32(SOT_TOKEN),
        jnp.where(pos == eot_pos, jnp.int32(EOT_TOKEN),
                  jnp.where(pos < eot_pos, shifted, jnp.int32(0))))


class ClipTokenizer:
    """JAX/Pallas counterpart of the PyTorch ClipTokenizer module."""

    def __init__(self, context_length, *, block_rows=512, min_pallas_batch=512):
        self.context_length = context_length
        self.block_rows = block_rows
        self.min_pallas_batch = min_pallas_batch

    def get_vocab_size(self):
        return VOCAB_SIZE

    def get_eot_token(self):
        return EOT_TOKEN

    def get_sot_token(self):
        return SOT_TOKEN

    def __call__(self, raw_tokens, lengths):
        # TODO(synk): the string -> BPE-id encoding (open_clip's byte-pair
        # merge loop) is host-side string processing with no Pallas
        # equivalent; this forward consumes pre-encoded BPE ids instead.
        B = raw_tokens.shape[0]
        if B < self.min_pallas_batch:
            out = clip_tokenize_pack_jnp(raw_tokens, lengths,
                                         self.context_length)
        else:
            out = clip_tokenize_pack(raw_tokens, lengths, self.context_length,
                                     block_rows=self.block_rows)
        assert out.shape[-1] == self.context_length, \
            'Tokenized tensor should be exactly `context_length` long.'
        return out


def _reference_pack(raw_tokens, lengths, context_length):
    """Pure-numpy reference mirroring open_clip.tokenize packing."""
    raw = np.asarray(raw_tokens)
    lens = np.asarray(lengths)
    B = raw.shape[0]
    out = np.zeros((B, context_length), dtype=np.int32)
    for i in range(B):
        n = int(np.clip(lens[i], 0, context_length - 2))
        toks = [SOT_TOKEN] + list(raw[i, :n]) + [EOT_TOKEN]
        out[i, :len(toks)] = toks
    return out


if __name__ == "__main__":
    # Real CLIP context length (77 — not a multiple of 128) to exercise the
    # lane-padding path; small batch with a small tile to exercise the
    # multi-step grid and the batch-padding path.
    B = 24
    CONTEXT_LENGTH = 77

    key = jax.random.PRNGKey(0)
    raw_tokens = jax.random.randint(
        key, (B, CONTEXT_LENGTH), minval=1, maxval=49000, dtype=jnp.int32)
    # Per-row BPE lengths: short, empty, exact fit, overflow (truncated), etc.
    base = jnp.array([5, 0, CONTEXT_LENGTH - 2, CONTEXT_LENGTH - 1,
                      33, 12, 1, 40], dtype=jnp.int32)
    lengths = jnp.tile(base, B // 8)

    ref = _reference_pack(raw_tokens, lengths, CONTEXT_LENGTH)

    # 1) Pallas path: TB=8 -> grid of 3 steps, ctx 77 -> 128 internally.
    out = clip_tokenize_pack(raw_tokens, lengths, CONTEXT_LENGTH, block_rows=8)
    out = jax.block_until_ready(out)
    np.testing.assert_array_equal(np.asarray(out), ref)

    # 2) Pallas path with a batch that is NOT a multiple of the tile (pads).
    out2 = clip_tokenize_pack(raw_tokens[:20], lengths[:20], CONTEXT_LENGTH,
                              block_rows=8)
    out2 = jax.block_until_ready(out2)
    np.testing.assert_array_equal(np.asarray(out2), ref[:20])

    # 3) Module dispatch: tiny batch -> plain-jnp fallback (no kernel launch).
    tokenizer = ClipTokenizer(CONTEXT_LENGTH)
    out3 = jax.block_until_ready(tokenizer(raw_tokens, lengths))
    np.testing.assert_array_equal(np.asarray(out3), ref)

    print("KERNEL_OK")
</pallas_src>

<mosaic_0001>
module attributes {stable_mosaic.version = 11 : i64} {
  func.func @_pack_kernel(%arg0: i32, %arg1: memref<8x1xi32, #tpu.memory_space<vmem>>, %arg2: memref<8x128xi32, #tpu.memory_space<vmem>>, %arg3: memref<8x128xi32, #tpu.memory_space<vmem>>) attributes {dimension_semantics = [#tpu.dimension_semantics<parallel>], iteration_bounds = array<i64: 3>, scalar_prefetch = 0 : i64, scratch_operands = 0 : i64, tpu.core_type = #tpu.core_type<tc>, window_params = [{transform_indices = @transform_0, window_bounds = array<i64: 8, 1>}, {transform_indices = @transform_1, window_bounds = array<i64: 8, 128>}, {transform_indices = @transform_2, window_bounds = array<i64: 8, 128>}]} {
    %c0 = arith.constant 0 : index
    %c0_0 = arith.constant 0 : index
    %0 = vector.load %arg2[%c0, %c0_0] : memref<8x128xi32, #tpu.memory_space<vmem>>, vector<8x128xi32>
    %c0_1 = arith.constant 0 : index
    %c0_2 = arith.constant 0 : index
    %1 = vector.load %arg1[%c0_1, %c0_2] : memref<8x1xi32, #tpu.memory_space<vmem>>, vector<8x1xi32>
    %c0_i32 = arith.constant 0 : i32
    %c75_i32 = arith.constant 75 : i32
    %2 = vector.broadcast %c0_i32 : i32 to vector<8x1xi32>
    %3 = arith.maxsi %2, %1 : vector<8x1xi32>
    %4 = vector.broadcast %c75_i32 : i32 to vector<8x1xi32>
    %5 = arith.minsi %4, %3 : vector<8x1xi32>
    %c1_i32 = arith.constant 1 : i32
    %6 = vector.broadcast %c1_i32 : i32 to vector<8x1xi32>
    %7 = arith.addi %5, %6 : vector<8x1xi32>
    %c1_i32_3 = arith.constant 1 : i32
    %8 = tpu.dynamic_rotate %0 by %c1_i32_3 dim 1 : vector<8x128xi32>, i32 -> vector<8x128xi32>
    %9 = tpu.iota {dimensions = array<i32: 1>} : vector<8x128xi32>
    %c0_i32_4 = arith.constant 0 : i32
    %10 = vector.broadcast %c0_i32_4 : i32 to vector<8x128xi32>
    %11 = arith.cmpi eq, %9, %10 : vector<8x128xi32>
    %12 = vector.broadcast %7 : vector<8x1xi32> to vector<8x128xi32>
    %13 = arith.cmpi eq, %9, %12 : vector<8x128xi32>
    %14 = vector.broadcast %7 : vector<8x1xi32> to vector<8x128xi32>
    %15 = arith.cmpi slt, %9, %14 : vector<8x128xi32>
    %c0_i32_5 = arith.constant 0 : i32
    %16 = vector.broadcast %c0_i32_5 : i32 to vector<8x128xi32>
    %17 = arith.select %15, %8, %16 : vector<8x128xi1>, vector<8x128xi32>
    %c49407_i32 = arith.constant 49407 : i32
    %18 = vector.broadcast %c49407_i32 : i32 to vector<8x128xi32>
    %19 = arith.select %13, %18, %17 : vector<8x128xi1>, vector<8x128xi32>
    %c49406_i32 = arith.constant 49406 : i32
    %20 = vector.broadcast %c49406_i32 : i32 to vector<8x128xi32>
    %21 = arith.select %11, %20, %19 : vector<8x128xi1>, vector<8x128xi32>
    %c0_6 = arith.constant 0 : index
    %c0_7 = arith.constant 0 : index
    %22 = vector.load %arg3[%c0_6, %c0_7] : memref<8x128xi32, #tpu.memory_space<vmem>>, vector<8x128xi32>
    tpu.vector_store %arg3[%c0_6, %c0_7], %21 {strides = array<i32>} : memref<8x128xi32, #tpu.memory_space<vmem>>, vector<8x128xi32>,
    return
  }
  func.func @transform_0(%arg0: i32) -> (i32, i32) {
    %c0_i32 = arith.constant 0 : i32
    %c0_i32_0 = arith.constant 0 : i32
    return %arg0, %c0_i32 : i32, i32
  }
  func.func @transform_1(%arg0: i32) -> (i32, i32) {
    %c0_i32 = arith.constant 0 : i32
    %c0_i32_0 = arith.constant 0 : i32
    return %arg0, %c0_i32 : i32, i32
  }
  func.func @transform_2(%arg0: i32) -> (i32, i32) {
    %c0_i32 = arith.constant 0 : i32
    %c0_i32_0 = arith.constant 0 : i32
    return %arg0, %c0_i32 : i32, i32
  }
}

</mosaic_0001>

<bundles_post_ra>
// kernel: tpu_custom_call.1
= control target key start
LH: loop header
LB: loop body
LE: loop exit
PB: predicated region body
PF: predicated region fallthrough
CT: control target
= control target key end

     0   :  { %7 = vsyncpa [#allocation3], 0  ;;  %s486_s0 = inlined_call_operand.vmem [shape: s32[24,1], index: 0, kind: input, shape index: {}]   ;;  %s487_s1 = inlined_call_operand.vmem [shape: s32[24,128], index: 1, kind: input, shape index: {}]   ;;  %s488_s2 = inlined_call_operand.hbm [shape: s32[24,128], index: 2, kind: output, shape index: {}]  }
   0x1   :  { %9 = vsyncpa [#allocation3 + $0x1], 0  ;;  %s398_s9 = smov 0   ;;  %s400_s10 = smov 0  }
   0x2   :  { %s402_s11 = smov 0   ;;  %s404_s12 = smov 0  }
   0x3 LB: > { %s419_s13 = sadd.s32 4294967295, %s379_s12   ;;  %s264_s14 = sadd.s32 4294967294, %s379_s12   ;;  %s379_s12 = sphi %s404_s12, %s494_s12   ;;  %s375_s11 = sphi %s402_s11, %s493_s11   ;;  %s371_s10 = sphi %s400_s10, %s492_s10   ;;  %s367_s9 = sphi %s398_s9, %s491_s9  }
   0x4   : > { %s423_s15 = sadd.s32 1, %s379_s12   ;;  %s74_s16 = sadd.s32 1, %s375_s11 }
   0x5   : > { %s71_s17 = ssub.s32 %s379_s12, %s423_s15  ;;  %p84_p0 = scmp.ne.s32.totalorder %s375_s11, %s371_s10 }
   0x6   : > { %p72_p1 = scmp.eq.s32.totalorder %s71_s17, 0  ;;  %p85_p2 = scmp.eq.s32.totalorder %s419_s13, 2 }
   0x7   : > { %p90_p3 = scmp.ne.s32.totalorder %s371_s10, %s367_s9  ;;  %p91_p4 = scmp.eq.s32.totalorder %s264_s14, 2 }
   0x8   : > { %s434_s18 = scalar_select %p72_p1, %s375_s11, %s74_s16  }
   0x9   : > { %p436_p5 = por %p85_p2, %p84_p0  ;;  %p440_p6 = por %p91_p4, %p90_p3 }
   0xa   : > { %p267_p7 = scmp.ge.s32.totalorder %s379_s12, 1  ;;  %p123_p8 = scmp.lt.s32.totalorder %s379_s12, 4 }
   0xc   : > { %p124_p9 = pnand %p267_p7, %p123_p8 }
   0xd   : > { %p148_p10 = scmp.lt.s32.totalorder (!%p124_p9), %s419_s13, 2  ;;  %s382_s29 = smov (!%p124_p9), 1  }
   0xe   : > { %127 = sbr.rel (%p124_p9) target bundleno = 159 (0x9f), region = 28  ;;  %s145_s30 = sand.u32 (!%p124_p9), 1, %s371_s10  }
   0xf   : > { %s268_s3 = sshll.u32 (!%p124_p9), %s145_s30, 3  ;;  %s272_s4 = sshll.u32 (!%p124_p9), %s419_s13, 3 }
  0x10   : > { %s188_s7 = scalar_lea.hbm (!%p124_p9), %s488_s2, %s272_s4  ;;  %s147_s8 = scalar_lea.vmem (!%p124_p9), [#allocation2], %s268_s3 }
  0x11   : > { %s190_s14 = sshll.u32 (!%p124_p9), %s147_s8, 4  ;;  %s192_s16 = sshll.u32 (!%p124_p9), %s188_s7, 4  ;;  %s191_s14 = int_to_ptr.vmem [resolvable:$true] %s190_s14  ;;  %s193_s16 = int_to_ptr.hbm [resolvable:$true] %s192_s16 }
  0x12   : > { %s331_s17 = sshra.s32 (!%p124_p9), %s193_s16, 4  ;;  %s337_s24 = scalar_lea.hbm (!%p124_p9), %s488_s2, 24  ;;  %s332_s17 = int_to_ptr.hbm [resolvable:$true] %s331_s17 }
  0x13   : > { %v381_v0 = vmov 0   ;;  %s149_s21 = scalar_select %p148_p10, %s419_s13, 2  ;;  %v165_v6 = vlaneseq }
  0x14   : > { %316 = vset.pattern.permute.xlu0 %v381_v0  ;;  %s178_s13 = scalar_lea.sflag [#allocation3], %s145_s30  ;;  %p338_p0 = scmp.lt.s32.totalorder %s332_s17, %s488_s2 }
  0x15   : > { %s269_s22 = sshll.u32 %s149_s21, 3  ;;  %v166_v8 = vand.u32 127, %v165_v6  ;;  %s333_s21 = scalar_lea.hbm %s332_s17, 8 }
  0x16   : > { %s151_s25 = scalar_lea.vmem %s486_s0, %s269_s22  ;;  %s155_s28 = scalar_lea.vmem %s487_s1, %s269_s22 }
  0x17   : > { %v157_v1 = vld [vmem:[%s151_s25] sm:$0xff]  ;;  %vm167_vm2 = vcmp.eq.s32.totalorder %v166_v8, 0  ;;  %p334_p11 = scmp.ne.s32.totalorder %s332_s17, %s333_s21  ;;  %p339_p1 = scmp.lt.s32.totalorder %s337_s24, %s333_s21 }
  0x18   : > { %vm158_vm0 = vcmp.gt.s32.totalorder %v157_v1, 0  ;;  %v156_v5 = vld [vmem:[%s155_s28] sm:$0xff] }
  0x19   : > { %v159_v2 = vsel %vm158_vm0, %v157_v1, 0  ;;  %p335_p12 = pnand %p334_p11, %p436_p5  ;;  %p340_p2 = por %p339_p1, %p338_p0 }
  0x1a   : > { %vm160_vm1 = vcmp.lt.s32.totalorder %v159_v2, 75 }
  0x1b   : > { %v161_v3 = vsel %vm160_vm1, %v159_v2, 75  ;;  %p336_p13 = pneg %p335_p12 }
  0x1c   : > { %v162_v4 = vadd.s32 1, %v161_v3 }
  0x1d   : > { %p341_p3 = pnand %p340_p2, %p336_p13 }
  0x1e   : > { %169 = vperm.xlu0 %316, %v162_v4  }
  0x26   : > { %163 = vrot.lane.b32.xlu0 %v156_v5, %s382_s29 }
  0x90   : > { %v170_v7 = vpop.permute.xlu0 %169 }
  0x91   : > { %vm172_vm3 = vcmp.lt.s32.totalorder %v166_v8, %v170_v7  ;;  %vm171_vm4 = vcmp.eq.s32.totalorder %v166_v8, %v170_v7 }
  0x98   : > { %v164_v9 = vpop.permute.xlu0 %163 }
  0x99   : > { %v173_v10 = vsel %vm172_vm3, %v164_v9, 0 }
  0x9a   : > { %v174_v11 = vsel %vm171_vm4, 49407, %v173_v10 }
  0x9b   : > { %v175_v12 = vsel %vm167_vm2, 49406, %v174_v11 }
  0x9c   : > { %176 = vst [vmem:[%s147_s8] sm:$0xff] %v175_v12 }
  0x9d   : > { %344 = shalt.err (!%p341_p3)
}
  0x9e   : > { %275 = dma.vmem_to_hbm [thread:$0]  (%p436_p5), %s191_s14, 128, %s193_s16, %s178_s13  }
  0x9f PF: > { %p281_p4 = scmp.ge.s32.totalorder %s379_s12, 2  ;;  %s204_s27 = sand.u32 1, %s367_s9  }
  0xa0   : > { %s205_s28 = scalar_lea.sflag [#allocation3], %s204_s27 }
  0xa1   : > { %p278_p7 = pnand %p281_p4, %p440_p6 }
  0xa3   : > { %p279_p8 = pneg %p278_p7 }
  0xa5   : > { %362 = dma.done.wait (%p279_p8), %s205_s28, 128  }
  0xa6   : > { %364 = vsyncadd (%p279_p8), %s205_s28, 4294967168  ;;  %p12_p9 = scmp.ge.s32.totalorder %s423_s15, 5   ;;  %s491_s9 = smov %s371_s10 }
  0xa7   : > { %s492_s10 = smov %s375_s11  ;;  %s493_s11 = smov %s434_s18 }
  0xa8   : > { %s494_s12 = smov %s423_s15  ;;  %14 = sbr.rel (!%p12_p9) target bundleno = 3 (0x3), region = 66 }
  0xad   :  { %211 = vsyncpa [#allocation3], 1 }
  0xae   :  { %213 = vsyncpa [#allocation3 + $0x1], 1 }

</bundles_post_ra>
